<compile_context>
chip_gen: v6e
topology: v6e:2x2x1
jax: 0.10.0
libtpu: 0.0.40
codegen_flags: <defaults>
</compile_context>

<pallas_src>
import functools
from typing import List, Optional, Sequence, Tuple

import jax
import jax.numpy as jnp
from jax.experimental import pallas as pl
from jax.experimental.pallas import tpu as pltpu

_LANE = 128      # lane width (last-dim granularity for f32)
_SUBLANE = 8     # sublane width (second-to-last-dim granularity for f32)


def _round_up(x: int, m: int) -> int:
    return (x + m - 1) // m * m


def _validate_activation(act: Optional[str]) -> str:
    act = "identity" if act is None else act
    if act not in ("relu", "identity"):
        # TODO(synk): only ReLU / Identity (the module's defaults) are mapped;
        # other torch activations would need an entry in _apply_activation.
        raise ValueError(f"unsupported activation: {act!r}")
    return act


def _apply_activation(h, act: str):
    if act == "relu":
        return jnp.maximum(h, 0.0)
    return h  # identity


def _choose_batch_tile(batch: int, target: int) -> int:
    """Batch tile: multiple of 8 rows (or the full batch), minimal padding
    waste, and >=2 tiles for large single-tile batches so both v7x TCs work."""
    if batch <= target:
        half = _round_up(pl.cdiv(batch, 2), _SUBLANE)
        if batch >= 64 and half < batch:
            return half          # two tiles; ragged last block handled by Pallas
        return batch             # single full-extent tile, zero padding
    return target


def _largest_divisor_tile(dim: int, cap: int, step: int = _LANE) -> int:
    """Largest multiple of `step` <= cap that divides `dim` (dim % step == 0)."""
    if dim <= cap:
        return dim
    best = step
    for t in range(step, cap + 1, step):
        if dim % t == 0:
            best = t
    return best


def _vmem_budget_bytes() -> int:
    """Per-core VMEM budget with headroom (<=96 MiB on v5e/v6e, <=48 MiB on v7x)."""
    try:
        cap = pltpu.get_tpu_info().vmem_capacity_bytes
    except Exception:
        cap = 64 << 20  # assume the smallest per-core VMEM (v7x) when unknown
    return int(cap) * 3 // 4


def _fused_vmem_need_bytes(tb: int, in_features: int,
                           params: Sequence[Tuple[jax.Array, jax.Array]],
                           weight_buffers: int) -> int:
    weight_bytes = sum(w.size * w.dtype.itemsize + b.size * b.dtype.itemsize
                       for w, b in params)
    widths = [in_features] + [int(w.shape[1]) for w, _ in params]
    io_bytes = 2 * tb * (widths[0] + widths[-1]) * 4   # double-buffered x / out tiles
    act_bytes = 2 * tb * max(widths) * 4               # live activations / spill slack
    return weight_buffers * weight_bytes + io_bytes + act_bytes


# ---------------------------------------------------------------------------
# Primary path: whole MLP fused in one pallas_call, weights VMEM-resident.
# ---------------------------------------------------------------------------

def _mlp_fused_kernel(*refs, activations: Sequence[str]):
    """refs = (x_ref, w0_ref, b0_ref, w1_ref, b1_ref, ..., o_ref)."""
    n_layers = len(activations)
    x_ref = refs[0]
    o_ref = refs[1 + 2 * n_layers]

    h = x_ref[...]
    for i, act in enumerate(activations):
        w = refs[1 + 2 * i][...]
        b = refs[2 + 2 * i][...]
        if h.dtype != w.dtype:
            h = h.astype(w.dtype)  # bf16 weights -> bf16 MXU inputs, f32 accumulate
        h = jnp.dot(h, w, preferred_element_type=jnp.float32) + b
        h = _apply_activation(h, act)
    if h.dtype != o_ref.dtype:
        h = h.astype(o_ref.dtype)
    o_ref[...] = h


def _mlp_fused_call(x, params, activations, tb, vmem_limit, single_buffer_weights):
    B, In = x.shape
    out_pad = int(params[-1][0].shape[1])
    grid = (pl.cdiv(B, tb),)

    weight_mode = pl.Buffered(buffer_count=1) if single_buffer_weights else None

    def const_spec(shape):
        # Constant-index blocks are fetched once; double-buffering them only
        # doubles the resident-weight VMEM footprint (worst on v7x per-TC copies).
        if weight_mode is None:
            return pl.BlockSpec(shape, lambda i: (0, 0))
        return pl.BlockSpec(shape, lambda i: (0, 0), pipeline_mode=weight_mode)

    in_specs = [pl.BlockSpec((tb, In), lambda i: (i, 0))]   # raw x, no lane padding
    flat_inputs = [x]
    flops = 0
    bytes_accessed = x.size * x.dtype.itemsize
    for w, b in params:
        in_specs.append(const_spec(w.shape))
        in_specs.append(const_spec(b.shape))
        flat_inputs.append(w)
        flat_inputs.append(b)
        flops += 2 * B * int(w.shape[0]) * int(w.shape[1])
        bytes_accessed += w.size * w.dtype.itemsize + b.size * b.dtype.itemsize
    bytes_accessed += B * out_pad * 4   # f32 output writeback

    return pl.pallas_call(
        functools.partial(_mlp_fused_kernel, activations=tuple(activations)),
        out_shape=jax.ShapeDtypeStruct((B, out_pad), jnp.float32),
        grid=grid,
        in_specs=in_specs,
        out_specs=pl.BlockSpec((tb, out_pad), lambda i: (i, 0)),
        compiler_params=pltpu.CompilerParams(
            dimension_semantics=("parallel",),
            vmem_limit_bytes=int(vmem_limit),
        ),
        cost_estimate=pl.CostEstimate(
            flops=int(flops), transcendentals=0, bytes_accessed=int(bytes_accessed)),
    )(*flat_inputs)


def mlp_forward_fused(x, params, activations, out_features, batch_tile=512):
    B, In = x.shape
    tb = _choose_batch_tile(B, batch_tile)
    budget = _vmem_budget_bytes()
    need = _fused_vmem_need_bytes(tb, In, params, weight_buffers=2)
    vmem_limit = min(budget, max(2 * need, 48 << 20))
    try:
        out = _mlp_fused_call(x, params, activations, tb, vmem_limit,
                              single_buffer_weights=True)
    except Exception:
        # Older jax without BlockSpec(pipeline_mode=...)/pl.Buffered(1):
        # fall back to default (double-buffered) weight blocks.
        out = _mlp_fused_call(x, params, activations, tb, vmem_limit,
                              single_buffer_weights=False)
    return out[:, :out_features]


# ---------------------------------------------------------------------------
# Fallback path: per-layer K/N-tiled matmul (for weights that exceed VMEM,
# e.g. wide MLPs on v7x's 64 MiB per core).
# ---------------------------------------------------------------------------

def _layer_kernel(x_ref, w_ref, b_ref, o_ref, acc_ref, *, activation: str):
    k = pl.program_id(2)

    @pl.when(k == 0)
    def _init():
        acc_ref[...] = jnp.zeros_like(acc_ref)

    x = x_ref[...]
    w = w_ref[...]
    if x.dtype != w.dtype:
        x = x.astype(w.dtype)
    acc_ref[...] += jnp.dot(x, w, preferred_element_type=jnp.float32)

    @pl.when(k == pl.num_programs(2) - 1)
    def _finalize():
        h = _apply_activation(acc_ref[...] + b_ref[...], activation)
        o_ref[...] = h.astype(o_ref.dtype)


def _layer_forward_tiled(x, w, b, activation, tb, tn_cap=512, tk_cap=512):
    B, K = x.shape
    Kw, N = w.shape
    assert K == Kw, (K, Kw)
    tn = _largest_divisor_tile(N, tn_cap)   # N, K are 128-multiples in this path
    tk = _largest_divisor_tile(K, tk_cap)
    grid = (pl.cdiv(B, tb), N // tn, K // tk)
    return pl.pallas_call(
        functools.partial(_layer_kernel, activation=activation),
        out_shape=jax.ShapeDtypeStruct((B, N), jnp.float32),
        grid=grid,
        in_specs=[
            pl.BlockSpec((tb, tk), lambda i, j, k: (i, k)),
            pl.BlockSpec((tk, tn), lambda i, j, k: (k, j)),
            pl.BlockSpec((1, tn), lambda i, j, k: (0, j)),
        ],
        out_specs=pl.BlockSpec((tb, tn), lambda i, j, k: (i, j)),
        scratch_shapes=[pltpu.VMEM((tb, tn), jnp.float32)],
        compiler_params=pltpu.CompilerParams(
            dimension_semantics=("parallel", "parallel", "arbitrary"),
        ),
    )(x, w, b)


def mlp_forward_tiled(x, tiled_params, activations, out_features, batch_tile=512):
    B, In = x.shape
    in_pad = int(tiled_params[0][0].shape[0])
    if In != in_pad:
        # Lane-pad the input once so the K grid axis stays 128-aligned
        # (only on this non-default streaming path).
        x = jnp.pad(x, ((0, 0), (0, in_pad - In)))
    tb = _choose_batch_tile(B, batch_tile)
    h = x
    for (w, b), act in zip(tiled_params, activations):
        h = _layer_forward_tiled(h, w, b, act, tb)
    return h[:, :out_features]


# ---------------------------------------------------------------------------
# Module wrapper
# ---------------------------------------------------------------------------

class NeuralNetworkPallas:
    """JAX/Pallas re-implementation of NeuralNetUtils.NeuralNetwork forward.

    Each layer is nn.Linear(in, out) followed by its activation (ReLU for every
    layer when layerActivationFunctions is None; a None entry means Identity).
    """

    def __init__(self, input_feature_count: int, layer_node_counts: List[int],
                 layer_activations: Optional[List[Optional[str]]], key: jax.Array,
                 weight_dtype=jnp.float32, batch_tile: int = 512):
        if layer_activations is None:
            layer_activations = ["relu"] * len(layer_node_counts)
        self.input_feature_count = int(input_feature_count)
        self.out_features = int(layer_node_counts[-1])
        self.batch_tile = int(batch_tile)
        self.activations = [_validate_activation(a) for a in layer_activations]

        self.params: List[Tuple[jax.Array, jax.Array]] = []        # unpadded f32 (reference)
        self.fused_params: List[Tuple[jax.Array, jax.Array]] = []  # layer-0 K unpadded
        self.tiled_params: List[Tuple[jax.Array, jax.Array]] = []  # fully K/N padded
        last = self.input_feature_count
        for node_count in layer_node_counts:
            key, kw, kb = jax.random.split(key, 3)
            bound = 1.0 / (last ** 0.5)  # mimics torch nn.Linear default init
            w = jax.random.uniform(kw, (node_count, last), jnp.float32, -bound, bound)
            b = jax.random.uniform(kb, (node_count,), jnp.float32, -bound, bound)
            w_t = w.T                                      # (in, out)
            self.params.append((w_t, b))

            in_pad = _round_up(last, _LANE)
            out_pad = _round_up(node_count, _LANE)
            w_kpad = jnp.zeros((in_pad, out_pad), jnp.float32).at[:last, :node_count].set(w_t)
            w_kpad = w_kpad.astype(weight_dtype)
            b_pad = jnp.zeros((1, out_pad), jnp.float32).at[0, :node_count].set(b)
            if not self.fused_params:
                # Layer 0 keeps its raw K dim so x needs no lane padding / HBM copy.
                w_fused = jnp.zeros((last, out_pad), jnp.float32).at[:, :node_count].set(w_t)
                w_fused = w_fused.astype(weight_dtype)
            else:
                w_fused = w_kpad
            self.fused_params.append((w_fused, b_pad))
            self.tiled_params.append((w_kpad, b_pad))
            last = node_count

    def __call__(self, x: jax.Array, force_tiled: bool = False) -> jax.Array:
        tb = _choose_batch_tile(x.shape[0], self.batch_tile)
        need = _fused_vmem_need_bytes(tb, x.shape[1], self.fused_params, weight_buffers=2)
        if force_tiled or need > _vmem_budget_bytes():
            return mlp_forward_tiled(x, self.tiled_params, self.activations,
                                     self.out_features, self.batch_tile)
        return mlp_forward_fused(x, self.fused_params, self.activations,
                                 self.out_features, self.batch_tile)

    def reference(self, x: jax.Array) -> jax.Array:
        """Pure-JAX forward pass (unpadded, f32, highest precision)."""
        for (w_t, b), act in zip(self.params, self.activations):
            x = jnp.dot(x, w_t, precision=jax.lax.Precision.HIGHEST) + b
            x = _apply_activation(x, act)
        return x


if __name__ == "__main__":
    key = jax.random.PRNGKey(0)
    key, kx, kp = jax.random.split(key, 3)

    batch = 8
    input_feature_count = 32
    layer_node_counts = [64, 32, 16]
    layer_activations = None  # -> ReLU for every layer, per the PyTorch module

    net = NeuralNetworkPallas(input_feature_count, layer_node_counts,
                              layer_activations, kp)
    x = jax.random.normal(kx, (batch, input_feature_count), jnp.float32)
    ref = net.reference(x)

    # Fused single-kernel path (default).
    out = jax.block_until_ready(net(x))
    assert out.shape == (batch, layer_node_counts[-1])
    assert jnp.allclose(out, ref, atol=1e-4, rtol=1e-4), "fused kernel mismatch"

    # Streamed per-layer fallback (used when resident weights exceed VMEM, e.g. v7x).
    out_tiled = jax.block_until_ready(net(x, force_tiled=True))
    assert out_tiled.shape == (batch, layer_node_counts[-1])
    assert jnp.allclose(out_tiled, ref, atol=1e-4, rtol=1e-4), "tiled kernel mismatch"

    # bf16 weights + f32 accumulate (recommended for large models): loose tolerance.
    net_bf16 = NeuralNetworkPallas(input_feature_count, layer_node_counts,
                                   layer_activations, kp, weight_dtype=jnp.bfloat16)
    out_bf16 = jax.block_until_ready(net_bf16(x))
    assert jnp.allclose(out_bf16, net_bf16.reference(x), atol=5e-2, rtol=5e-2), \
        "bf16 kernel mismatch"

    print("KERNEL_OK")
</pallas_src>

<mosaic_0001>
module attributes {stable_mosaic.version = 11 : i64} {
  func.func @_mlp_fused_kernel(%arg0: i32, %arg1: memref<8x32xf32, #tpu.memory_space<vmem>>, %arg2: memref<32x128xf32, #tpu.memory_space<vmem>>, %arg3: memref<1x128xf32, #tpu.memory_space<vmem>>, %arg4: memref<128x128xf32, #tpu.memory_space<vmem>>, %arg5: memref<1x128xf32, #tpu.memory_space<vmem>>, %arg6: memref<128x128xf32, #tpu.memory_space<vmem>>, %arg7: memref<1x128xf32, #tpu.memory_space<vmem>>, %arg8: memref<8x128xf32, #tpu.memory_space<vmem>>) attributes {dimension_semantics = [#tpu.dimension_semantics<parallel>], iteration_bounds = array<i64: 1>, scalar_prefetch = 0 : i64, scratch_operands = 0 : i64, tpu.core_type = #tpu.core_type<tc>, window_params = [{transform_indices = @transform_0, window_bounds = array<i64: 8, 32>}, {pipeline_mode = #tpu.pipeline_mode<synchronous>, transform_indices = @transform_1, window_bounds = array<i64: 32, 128>}, {pipeline_mode = #tpu.pipeline_mode<synchronous>, transform_indices = @transform_2, window_bounds = array<i64: 1, 128>}, {pipeline_mode = #tpu.pipeline_mode<synchronous>, transform_indices = @transform_3, window_bounds = array<i64: 128, 128>}, {pipeline_mode = #tpu.pipeline_mode<synchronous>, transform_indices = @transform_4, window_bounds = array<i64: 1, 128>}, {pipeline_mode = #tpu.pipeline_mode<synchronous>, transform_indices = @transform_5, window_bounds = array<i64: 128, 128>}, {pipeline_mode = #tpu.pipeline_mode<synchronous>, transform_indices = @transform_6, window_bounds = array<i64: 1, 128>}, {transform_indices = @transform_7, window_bounds = array<i64: 8, 128>}]} {
    %c0 = arith.constant 0 : index
    %c0_0 = arith.constant 0 : index
    %0 = vector.load %arg1[%c0, %c0_0] : memref<8x32xf32, #tpu.memory_space<vmem>>, vector<8x32xf32>
    %c0_1 = arith.constant 0 : index
    %c0_2 = arith.constant 0 : index
    %1 = vector.load %arg2[%c0_1, %c0_2] : memref<32x128xf32, #tpu.memory_space<vmem>>, vector<32x128xf32>
    %c0_3 = arith.constant 0 : index
    %c0_4 = arith.constant 0 : index
    %2 = vector.load %arg3[%c0_3, %c0_4] : memref<1x128xf32, #tpu.memory_space<vmem>>, vector<1x128xf32>
    %cst = arith.constant dense<0.000000e+00> : vector<8x128xf32>
    %3 = tpu.matmul %0, %1, %cst {dimension_numbers = #tpu.dot_dimension_numbers<[1], [0], [0], [1], [0, 0, 1, 1], [], []>} : vector<8x32xf32>, vector<32x128xf32>, vector<8x128xf32> -> vector<8x128xf32>
    %4 = vector.broadcast %2 : vector<1x128xf32> to vector<8x128xf32>
    %5 = arith.addf %3, %4 : vector<8x128xf32>
    %cst_5 = arith.constant 0.000000e+00 : f32
    %6 = vector.broadcast %cst_5 : f32 to vector<8x128xf32>
    %7 = arith.maximumf %5, %6 : vector<8x128xf32>
    %c0_6 = arith.constant 0 : index
    %c0_7 = arith.constant 0 : index
    %8 = vector.load %arg4[%c0_6, %c0_7] : memref<128x128xf32, #tpu.memory_space<vmem>>, vector<128x128xf32>
    %c0_8 = arith.constant 0 : index
    %c0_9 = arith.constant 0 : index
    %9 = vector.load %arg5[%c0_8, %c0_9] : memref<1x128xf32, #tpu.memory_space<vmem>>, vector<1x128xf32>
    %cst_10 = arith.constant dense<0.000000e+00> : vector<8x128xf32>
    %10 = tpu.matmul %7, %8, %cst_10 {dimension_numbers = #tpu.dot_dimension_numbers<[1], [0], [0], [1], [0, 0, 1, 1], [], []>} : vector<8x128xf32>, vector<128x128xf32>, vector<8x128xf32> -> vector<8x128xf32>
    %11 = vector.broadcast %9 : vector<1x128xf32> to vector<8x128xf32>
    %12 = arith.addf %10, %11 : vector<8x128xf32>
    %cst_11 = arith.constant 0.000000e+00 : f32
    %13 = vector.broadcast %cst_11 : f32 to vector<8x128xf32>
    %14 = arith.maximumf %12, %13 : vector<8x128xf32>
    %c0_12 = arith.constant 0 : index
    %c0_13 = arith.constant 0 : index
    %15 = vector.load %arg6[%c0_12, %c0_13] : memref<128x128xf32, #tpu.memory_space<vmem>>, vector<128x128xf32>
    %c0_14 = arith.constant 0 : index
    %c0_15 = arith.constant 0 : index
    %16 = vector.load %arg7[%c0_14, %c0_15] : memref<1x128xf32, #tpu.memory_space<vmem>>, vector<1x128xf32>
    %cst_16 = arith.constant dense<0.000000e+00> : vector<8x128xf32>
    %17 = tpu.matmul %14, %15, %cst_16 {dimension_numbers = #tpu.dot_dimension_numbers<[1], [0], [0], [1], [0, 0, 1, 1], [], []>} : vector<8x128xf32>, vector<128x128xf32>, vector<8x128xf32> -> vector<8x128xf32>
    %18 = vector.broadcast %16 : vector<1x128xf32> to vector<8x128xf32>
    %19 = arith.addf %17, %18 : vector<8x128xf32>
    %cst_17 = arith.constant 0.000000e+00 : f32
    %20 = vector.broadcast %cst_17 : f32 to vector<8x128xf32>
    %21 = arith.maximumf %19, %20 : vector<8x128xf32>
    %c0_18 = arith.constant 0 : index
    %c0_19 = arith.constant 0 : index
    %22 = vector.load %arg8[%c0_18, %c0_19] : memref<8x128xf32, #tpu.memory_space<vmem>>, vector<8x128xf32>
    tpu.vector_store %arg8[%c0_18, %c0_19], %21 {strides = array<i32>} : memref<8x128xf32, #tpu.memory_space<vmem>>, vector<8x128xf32>,
    return
  }
  func.func @transform_0(%arg0: i32) -> (i32, i32) {
    %c0_i32 = arith.constant 0 : i32
    %c0_i32_0 = arith.constant 0 : i32
    return %arg0, %c0_i32 : i32, i32
  }
  func.func @transform_1(%arg0: i32) -> (i32, i32) {
    %c0_i32 = arith.constant 0 : i32
    %c0_i32_0 = arith.constant 0 : i32
    %c0_i32_1 = arith.constant 0 : i32
    return %c0_i32, %c0_i32_0 : i32, i32
  }
  func.func @transform_2(%arg0: i32) -> (i32, i32) {
    %c0_i32 = arith.constant 0 : i32
    %c0_i32_0 = arith.constant 0 : i32
    %c0_i32_1 = arith.constant 0 : i32
    return %c0_i32, %c0_i32_0 : i32, i32
  }
  func.func @transform_3(%arg0: i32) -> (i32, i32) {
    %c0_i32 = arith.constant 0 : i32
    %c0_i32_0 = arith.constant 0 : i32
    %c0_i32_1 = arith.constant 0 : i32
    return %c0_i32, %c0_i32_0 : i32, i32
  }
  func.func @transform_4(%arg0: i32) -> (i32, i32) {
    %c0_i32 = arith.constant 0 : i32
    %c0_i32_0 = arith.constant 0 : i32
    %c0_i32_1 = arith.constant 0 : i32
    return %c0_i32, %c0_i32_0 : i32, i32
  }
  func.func @transform_5(%arg0: i32) -> (i32, i32) {
    %c0_i32 = arith.constant 0 : i32
    %c0_i32_0 = arith.constant 0 : i32
    %c0_i32_1 = arith.constant 0 : i32
    return %c0_i32, %c0_i32_0 : i32, i32
  }
  func.func @transform_6(%arg0: i32) -> (i32, i32) {
    %c0_i32 = arith.constant 0 : i32
    %c0_i32_0 = arith.constant 0 : i32
    %c0_i32_1 = arith.constant 0 : i32
    return %c0_i32, %c0_i32_0 : i32, i32
  }
  func.func @transform_7(%arg0: i32) -> (i32, i32) {
    %c0_i32 = arith.constant 0 : i32
    %c0_i32_0 = arith.constant 0 : i32
    return %arg0, %c0_i32 : i32, i32
  }
}

module attributes {stable_mosaic.version = 11 : i64} {
  func.func @_mlp_fused_kernel(%arg0: i32, %arg1: memref<8x32xf32, #tpu.memory_space<vmem>>, %arg2: memref<32x128xf32, #tpu.memory_space<vmem>>, %arg3: memref<1x128xf32, #tpu.memory_space<vmem>>, %arg4: memref<128x128xf32, #tpu.memory_space<vmem>>, %arg5: memref<1x128xf32, #tpu.memory_space<vmem>>, %arg6: memref<128x128xf32, #tpu.memory_space<vmem>>, %arg7: memref<1x128xf32, #tpu.memory_space<vmem>>, %arg8: memref<8x128xf32, #tpu.memory_space<vmem>>) attributes {dimension_semantics = [#tpu.dimension_semantics<parallel>], iteration_bounds = array<i64: 1>, scalar_prefetch = 0 : i64, scratch_operands = 0 : i64, tpu.core_type = #tpu.core_type<tc>, window_params = [{transform_indices = @transform_0, window_bounds = array<i64: 8, 32>}, {pipeline_mode = #tpu.pipeline_mode<synchronous>, transform_indices = @transform_1, window_bounds = array<i64: 32, 128>}, {pipeline_mode = #tpu.pipeline_mode<synchronous>, transform_indices = @transform_2, window_bounds = array<i64: 1, 128>}, {pipeline_mode = #tpu.pipeline_mode<synchronous>, transform_indices = @transform_3, window_bounds = array<i64: 128, 128>}, {pipeline_mode = #tpu.pipeline_mode<synchronous>, transform_indices = @transform_4, window_bounds = array<i64: 1, 128>}, {pipeline_mode = #tpu.pipeline_mode<synchronous>, transform_indices = @transform_5, window_bounds = array<i64: 128, 128>}, {pipeline_mode = #tpu.pipeline_mode<synchronous>, transform_indices = @transform_6, window_bounds = array<i64: 1, 128>}, {transform_indices = @transform_7, window_bounds = array<i64: 8, 128>}]} {
    %c0 = arith.constant 0 : index
    %c0_0 = arith.constant 0 : index
    %0 = vector.load %arg1[%c0, %c0_0] : memref<8x32xf32, #tpu.memory_space<vmem>>, vector<8x32xf32>
    %c0_1 = arith.constant 0 : index
    %c0_2 = arith.constant 0 : index
    %1 = vector.load %arg2[%c0_1, %c0_2] : memref<32x128xf32, #tpu.memory_space<vmem>>, vector<32x128xf32>
    %c0_3 = arith.constant 0 : index
    %c0_4 = arith.constant 0 : index
    %2 = vector.load %arg3[%c0_3, %c0_4] : memref<1x128xf32, #tpu.memory_space<vmem>>, vector<1x128xf32>
    %cst = arith.constant dense<0.000000e+00> : vector<8x128xf32>
    %3 = tpu.matmul %0, %1, %cst {dimension_numbers = #tpu.dot_dimension_numbers<[1], [0], [0], [1], [0, 0, 1, 1], [], []>} : vector<8x32xf32>, vector<32x128xf32>, vector<8x128xf32> -> vector<8x128xf32>
    %4 = vector.broadcast %2 : vector<1x128xf32> to vector<8x128xf32>
    %5 = arith.addf %3, %4 : vector<8x128xf32>
    %cst_5 = arith.constant 0.000000e+00 : f32
    %6 = vector.broadcast %cst_5 : f32 to vector<8x128xf32>
    %7 = arith.maximumf %5, %6 : vector<8x128xf32>
    %c0_6 = arith.constant 0 : index
    %c0_7 = arith.constant 0 : index
    %8 = vector.load %arg4[%c0_6, %c0_7] : memref<128x128xf32, #tpu.memory_space<vmem>>, vector<128x128xf32>
    %c0_8 = arith.constant 0 : index
    %c0_9 = arith.constant 0 : index
    %9 = vector.load %arg5[%c0_8, %c0_9] : memref<1x128xf32, #tpu.memory_space<vmem>>, vector<1x128xf32>
    %cst_10 = arith.constant dense<0.000000e+00> : vector<8x128xf32>
    %10 = tpu.matmul %7, %8, %cst_10 {dimension_numbers = #tpu.dot_dimension_numbers<[1], [0], [0], [1], [0, 0, 1, 1], [], []>} : vector<8x128xf32>, vector<128x128xf32>, vector<8x128xf32> -> vector<8x128xf32>
    %11 = vector.broadcast %9 : vector<1x128xf32> to vector<8x128xf32>
    %12 = arith.addf %10, %11 : vector<8x128xf32>
    %cst_11 = arith.constant 0.000000e+00 : f32
    %13 = vector.broadcast %cst_11 : f32 to vector<8x128xf32>
    %14 = arith.maximumf %12, %13 : vector<8x128xf32>
    %c0_12 = arith.constant 0 : index
    %c0_13 = arith.constant 0 : index
    %15 = vector.load %arg6[%c0_12, %c0_13] : memref<128x128xf32, #tpu.memory_space<vmem>>, vector<128x128xf32>
    %c0_14 = arith.constant 0 : index
    %c0_15 = arith.constant 0 : index
    %16 = vector.load %arg7[%c0_14, %c0_15] : memref<1x128xf32, #tpu.memory_space<vmem>>, vector<1x128xf32>
    %cst_16 = arith.constant dense<0.000000e+00> : vector<8x128xf32>
    %17 = tpu.matmul %14, %15, %cst_16 {dimension_numbers = #tpu.dot_dimension_numbers<[1], [0], [0], [1], [0, 0, 1, 1], [], []>} : vector<8x128xf32>, vector<128x128xf32>, vector<8x128xf32> -> vector<8x128xf32>
    %18 = vector.broadcast %16 : vector<1x128xf32> to vector<8x128xf32>
    %19 = arith.addf %17, %18 : vector<8x128xf32>
    %cst_17 = arith.constant 0.000000e+00 : f32
    %20 = vector.broadcast %cst_17 : f32 to vector<8x128xf32>
    %21 = arith.maximumf %19, %20 : vector<8x128xf32>
    %c0_18 = arith.constant 0 : index
    %c0_19 = arith.constant 0 : index
    %22 = vector.load %arg8[%c0_18, %c0_19] : memref<8x128xf32, #tpu.memory_space<vmem>>, vector<8x128xf32>
    tpu.vector_store %arg8[%c0_18, %c0_19], %21 {strides = array<i32>} : memref<8x128xf32, #tpu.memory_space<vmem>>, vector<8x128xf32>,
    return
  }
  func.func @transform_0(%arg0: i32) -> (i32, i32) {
    %c0_i32 = arith.constant 0 : i32
    %c0_i32_0 = arith.constant 0 : i32
    return %arg0, %c0_i32 : i32, i32
  }
  func.func @transform_1(%arg0: i32) -> (i32, i32) {
    %c0_i32 = arith.constant 0 : i32
    %c0_i32_0 = arith.constant 0 : i32
    %c0_i32_1 = arith.constant 0 : i32
    return %c0_i32, %c0_i32_0 : i32, i32
  }
  func.func @transform_2(%arg0: i32) -> (i32, i32) {
    %c0_i32 = arith.constant 0 : i32
    %c0_i32_0 = arith.constant 0 : i32
    %c0_i32_1 = arith.constant 0 : i32
    return %c0_i32, %c0_i32_0 : i32, i32
  }
  func.func @transform_3(%arg0: i32) -> (i32, i32) {
    %c0_i32 = arith.constant 0 : i32
    %c0_i32_0 = arith.constant 0 : i32
    %c0_i32_1 = arith.constant 0 : i32
    return %c0_i32, %c0_i32_0 : i32, i32
  }
  func.func @transform_4(%arg0: i32) -> (i32, i32) {
    %c0_i32 = arith.constant 0 : i32
    %c0_i32_0 = arith.constant 0 : i32
    %c0_i32_1 = arith.constant 0 : i32
    return %c0_i32, %c0_i32_0 : i32, i32
  }
  func.func @transform_5(%arg0: i32) -> (i32, i32) {
    %c0_i32 = arith.constant 0 : i32
    %c0_i32_0 = arith.constant 0 : i32
    %c0_i32_1 = arith.constant 0 : i32
    return %c0_i32, %c0_i32_0 : i32, i32
  }
  func.func @transform_6(%arg0: i32) -> (i32, i32) {
    %c0_i32 = arith.constant 0 : i32
    %c0_i32_0 = arith.constant 0 : i32
    %c0_i32_1 = arith.constant 0 : i32
    return %c0_i32, %c0_i32_0 : i32, i32
  }
  func.func @transform_7(%arg0: i32) -> (i32, i32) {
    %c0_i32 = arith.constant 0 : i32
    %c0_i32_0 = arith.constant 0 : i32
    return %arg0, %c0_i32 : i32, i32
  }
}

</mosaic_0001>

<bundles_post_ra>
// kernel: tpu_custom_call.1
= control target key start
LH: loop header
LB: loop body
LE: loop exit
PB: predicated region body
PF: predicated region fallthrough
CT: control target
= control target key end

     0   :  { %12 = vsyncpa [#allocation3], 0  ;;  %s738_s0 = inlined_call_operand.hbm [shape: f32[8,32], index: 0, kind: input, shape index: {}]   ;;  %s739_s1 = inlined_call_operand.hbm [shape: f32[32,128], index: 1, kind: input, shape index: {}]   ;;  %s740_s2 = inlined_call_operand.vmem [shape: f32[1,128], index: 2, kind: input, shape index: {}]   ;;  %s741_s3 = inlined_call_operand.hbm [shape: f32[128,128], index: 3, kind: input, shape index: {}]   ;;  %s742_s4 = inlined_call_operand.vmem [shape: f32[1,128], index: 4, kind: input, shape index: {}]   ;;  %s743_s5 = inlined_call_operand.hbm [shape: f32[128,128], index: 5, kind: input, shape index: {}]   ;;  %s744_s6 = inlined_call_operand.vmem [shape: f32[1,128], index: 6, kind: input, shape index: {}]   ;;  %s745_s7 = inlined_call_operand.hbm [shape: f32[8,128], index: 7, kind: output, shape index: {}]  }
   0x1   :  { %13 = vsyncpa [#allocation6], 0 }
   0x2   :  { %14 = vsyncpa [#allocation9], 0 }
   0x3   :  { %15 = vsyncpa [#allocation4], 0  ;;  %s614_s24 = smov [#allocation5]  }
   0x4   :  { %s31_s25 = sshll.u32 %s614_s24, 4  ;;  %s32_s25 = int_to_ptr.vmem [resolvable:$true] %s31_s25 }
   0x5   :  { %s514_s26 = scalar_lea.vmem %s32_s25, 512  ;;  %p519_p1 = scmp.lt.s32.totalorder %s32_s25, %s32_s25 }
   0x6   :  { %p515_p0 = scmp.ne.s32.totalorder %s32_s25, %s514_s26  ;;  %p520_p2 = scmp.lt.s32.totalorder %s514_s26, %s514_s26 }
   0x8   :  { %p521_p3 = por %p520_p2, %p519_p1 }
   0xa   :  { %p522_p4 = pnand %p521_p3, %p515_p0 }
   0xc   :  { %525 = shalt.err (!%p522_p4)
}
   0xd   :  { %s615_s27 = smov 128   ;;  %s616_s28 = smov 8  }
   0xe   :  { %37 = dma.hbm_to_vmem [thread:$0]  %s739_s1, 512, %s32_s25, [#allocation6], %s615_s27, %s615_s27, %s616_s28  }
   0xf   :  { %s617_s8 = smov [#allocation2]   ;;  %s618_s10 = smov [#allocation7]  }
  0x10   :  { %s22_s9 = sshll.u32 %s617_s8, 4  ;;  %s45_s11 = sshll.u32 %s618_s10, 4  ;;  %s23_s9 = int_to_ptr.vmem [resolvable:$true] %s22_s9  ;;  %s46_s11 = int_to_ptr.vmem [resolvable:$true] %s45_s11 }
  0x11   :  { %s534_s12 = scalar_lea.vmem %s23_s9, 128  ;;  %p539_p6 = scmp.lt.s32.totalorder %s23_s9, %s23_s9 }
  0x12   :  { %p535_p5 = scmp.ne.s32.totalorder %s23_s9, %s534_s12  ;;  %p540_p7 = scmp.lt.s32.totalorder %s534_s12, %s534_s12 }
  0x14   :  { %p541_p8 = por %p540_p7, %p539_p6 }
  0x16   :  { %p542_p9 = pnand %p541_p8, %p535_p5 }
  0x18   :  { %545 = shalt.err (!%p542_p9)
}
  0x19   :  { %25 = dma.hbm_to_vmem [thread:$0]  %s738_s0, 128, %s23_s9, [#allocation3]  }
  0x1a   :  { %s554_s15 = scalar_lea.vmem %s46_s11, 2048  ;;  %p559_p11 = scmp.lt.s32.totalorder %s46_s11, %s46_s11 }
  0x1b   :  { %p555_p10 = scmp.ne.s32.totalorder %s46_s11, %s554_s15  ;;  %p560_p12 = scmp.lt.s32.totalorder %s554_s15, %s554_s15 }
  0x1d   :  { %p561_p13 = por %p560_p12, %p559_p11 }
  0x1f   :  { %p562_p0 = pnand %p561_p13, %p555_p10 }
  0x21   :  { %565 = shalt.err (!%p562_p0)
}
  0x22   :  { %51 = dma.hbm_to_vmem [thread:$0]  %s741_s3, 2048, %s46_s11, [#allocation6], %s615_s27, %s615_s27, %s616_s28  }
  0x23   :  { %s619_s17 = smov [#allocation8]  }
  0x24   :  { %s59_s18 = sshll.u32 %s619_s17, 4  ;;  %s60_s18 = int_to_ptr.vmem [resolvable:$true] %s59_s18 }
  0x25   :  { %s574_s19 = scalar_lea.vmem %s60_s18, 2048  ;;  %p579_p2 = scmp.lt.s32.totalorder %s60_s18, %s60_s18 }
  0x26   :  { %p575_p1 = scmp.ne.s32.totalorder %s60_s18, %s574_s19  ;;  %p580_p3 = scmp.lt.s32.totalorder %s574_s19, %s574_s19 }
  0x28   :  { %p581_p4 = por %p580_p3, %p579_p2 }
  0x2a   :  { %p582_p5 = pnand %p581_p4, %p575_p1 }
  0x2c   :  { %585 = shalt.err (!%p582_p5)
}
  0x2d   :  { %65 = dma.hbm_to_vmem [thread:$0]  %s743_s5, 2048, %s60_s18, [#allocation9], %s615_s27, %s615_s27, %s616_s28  }
  0x2e   :  { %606 = dma.done.wait [#allocation3], 128  }
  0x2f   :  { %607 = vsyncadd [#allocation3], 4294967168 }
  0x30   :  { %608 = dma.done.wait [#allocation6], 2560  }
  0x31   :  { %609 = vsyncadd [#allocation6], 4294964736 }
  0x32   :  { %610 = dma.done.wait [#allocation9], 2048  }
  0x33   :  { %611 = vsyncadd [#allocation9], 4294965248  ;;  %v620_v0 = vmov 0.0   ;;  %vm621_vm0 = vmmov 0   ;;  %v84_v1 = vld [vmem:[#allocation5 + $0x18] sm:$0xff]  ;;  %v83_v2 = vld [vmem:[#allocation5 + $0x10] sm:$0xff] }
  0x34   :  { %416 = vmatprep.subr.mxu0 %v620_v0  ;;  %424 = vmatprep.mubr.msk.f32.mxu0 %vm621_vm0, %v620_v0  ;;  %v182_v3 = vld [vmem:[#allocation7 + $0x78] sm:$0xff]  ;;  %v82_v4 = vld [vmem:[#allocation5 + $0x8] sm:$0xff]  ;;  %v181_v5 = vld [vmem:[#allocation7 + $0x70] sm:$0xff]  ;;  %vm92_vm1 = vcmask 261120   ;;  %s622_s24 = smov [#allocation10]  }
  0x35   :  { %427 = vmatprep.subr.mxu1 %v620_v0  ;;  %459 = vmatprep.mubr.msk.f32.mxu1 %vm621_vm0, %v620_v0  ;;  %v180_v6 = vld [vmem:[#allocation7 + $0x68] sm:$0xff]  ;;  %v81_v7 = vld [vmem:[#allocation5] sm:$0xff]  ;;  %v80_v8 = vld [vmem:[#allocation2] sm:$0xff]  ;;  %s362_s25 = sshll.u32 %s622_s24, 4  ;;  %s363_s25 = int_to_ptr.vmem [resolvable:$true] %s362_s25 }
  0x36   :  { %417 = vmatpush3.msra.mxu0 %v84_v1  ;;  %428 = vmatpush3.msra.mxu1 %v182_v3  ;;  %v179_v9 = vld [vmem:[#allocation7 + $0x60] sm:$0xff]  ;;  %v178_v10 = vld [vmem:[#allocation7 + $0x58] sm:$0xff]  ;;  %v177_v11 = vld [vmem:[#allocation7 + $0x50] sm:$0xff]  ;;  %s586_s26 = scalar_lea.vmem %s363_s25, 128  ;;  %p591_p7 = scmp.lt.s32.totalorder %s363_s25, %s363_s25 }
  0x37   :  { %418 = vmatprep.subr.mxu0 %v620_v0  ;;  %429 = vmatprep.subr.mxu1 %v620_v0  ;;  %v176_v12 = vld [vmem:[#allocation7 + $0x48] sm:$0xff]  ;;  %v175_v13 = vld [vmem:[#allocation7 + $0x40] sm:$0xff]  ;;  %v174_v14 = vld [vmem:[#allocation7 + $0x38] sm:$0xff]  ;;  %p587_p6 = scmp.ne.s32.totalorder %s363_s25, %s586_s26  ;;  %p592_p8 = scmp.lt.s32.totalorder %s586_s26, %s586_s26 }
  0x38   :  { %419 = vmatpush3.msra.mxu0 %v83_v2  ;;  %430 = vmatpush3.msra.mxu1 %v181_v5  ;;  %v173_v15 = vld [vmem:[#allocation7 + $0x30] sm:$0xff]  ;;  %v172_v16 = vld [vmem:[#allocation7 + $0x28] sm:$0xff]  ;;  %v171_v17 = vld [vmem:[#allocation7 + $0x20] sm:$0xff] }
  0x39   :  { %420 = vmatprep.subr.mxu0 %v620_v0  ;;  %431 = vmatprep.subr.mxu1 %v620_v0  ;;  %v170_v18 = vld [vmem:[#allocation7 + $0x18] sm:$0xff]  ;;  %v169_v19 = vld [vmem:[#allocation7 + $0x10] sm:$0xff]  ;;  %v168_v20 = vld [vmem:[#allocation7 + $0x8] sm:$0xff]  ;;  %p593_p9 = por %p592_p8, %p591_p7 }
  0x3a   :  { %421 = vmatpush3.msra.mxu0 %v82_v4  ;;  %432 = vmatpush3.msra.mxu1 %v180_v6  ;;  %v167_v21 = vld [vmem:[#allocation7] sm:$0xff]  ;;  %v276_v22 = vld [vmem:[#allocation8 + $0x78] sm:$0xff]  ;;  %v275_v23 = vld [vmem:[#allocation8 + $0x70] sm:$0xff] }
  0x3b   :  { %422 = vmatprep.subr.mxu0 %v620_v0  ;;  %433 = vmatprep.subr.mxu1 %v620_v0  ;;  %v274_v24 = vld [vmem:[#allocation8 + $0x68] sm:$0xff]  ;;  %v273_v25 = vld [vmem:[#allocation8 + $0x60] sm:$0xff]  ;;  %v272_v26 = vld [vmem:[#allocation8 + $0x58] sm:$0xff]  ;;  %p594_p10 = pnand %p593_p9, %p587_p6 }
  0x3c   :  { %423 = vmatpush3.msra.mxu0 %v81_v7  ;;  %434 = vmatpush3.msra.mxu1 %v179_v9  ;;  %v271_v27 = vld [vmem:[#allocation8 + $0x50] sm:$0xff]  ;;  %v270_v28 = vld [vmem:[#allocation8 + $0x48] sm:$0xff]  ;;  %v269_v29 = vld [vmem:[#allocation8 + $0x40] sm:$0xff] }
  0x3d   :  { %425 = vmatmul.mubr.msk.f32.vlgmr.msra.gmra.mxu0 %vm92_vm1, %v80_v8  ;;  %435 = vmatprep.subr.mxu1 %v620_v0  ;;  %v268_v30 = vld [vmem:[#allocation8 + $0x38] sm:$0xff]  ;;  %v267_v31 = vld [vmem:[#allocation8 + $0x30] sm:$0xff]  ;;  %v266_v32 = vld [vmem:[#allocation8 + $0x28] sm:$0xff] }
  0x3e   :  { %462 = vmatprep.subr.mxu0 %v620_v0  ;;  %436 = vmatpush3.msra.mxu1 %v178_v10  ;;  %v265_v33 = vld [vmem:[#allocation8 + $0x20] sm:$0xff]  ;;  %v264_v34 = vld [vmem:[#allocation8 + $0x18] sm:$0xff]  ;;  %v263_v40 = vld [vmem:[#allocation8 + $0x10] sm:$0xff] }
  0x3f   :  { %494 = vmatprep.mubr.msk.f32.mxu0 %vm621_vm0, %v620_v0  ;;  %437 = vmatprep.subr.mxu1 %v620_v0  ;;  %v373_v35 = vld [vmem:[%s740_s2] ss:$0 sm:$0xff]  ;;  %v262_v41 = vld [vmem:[#allocation8 + $0x8] sm:$0xff]  ;;  %v261_v42 = vld [vmem:[#allocation8] sm:$0xff] }
  0x40   :  { %438 = vmatpush3.msra.mxu1 %v177_v11  ;;  %463 = vmatpush3.msra.mxu0 %v276_v22  ;;  %v375_v43 = vld [vmem:[%s742_s4] ss:$0 sm:$0xff] }
  0x41   :  { %439 = vmatprep.subr.mxu1 %v620_v0  ;;  %464 = vmatprep.subr.mxu0 %v620_v0  ;;  %v376_v48 = vld [vmem:[%s744_s6] ss:$0 sm:$0xff] }
  0x42   :  { %440 = vmatpush3.msra.mxu1 %v176_v12  ;;  %465 = vmatpush3.msra.mxu0 %v275_v23 }
  0x43   :  { %441 = vmatprep.subr.mxu1 %v620_v0  ;;  %466 = vmatprep.subr.mxu0 %v620_v0 }
  0x44   :  { %442 = vmatpush3.msra.mxu1 %v175_v13  ;;  %467 = vmatpush3.msra.mxu0 %v274_v24 }
  0x45   :  { %443 = vmatprep.subr.mxu1 %v620_v0  ;;  %468 = vmatprep.subr.mxu0 %v620_v0 }
  0x46   :  { %444 = vmatpush3.msra.mxu1 %v174_v14  ;;  %469 = vmatpush3.msra.mxu0 %v273_v25 }
  0x47   :  { %445 = vmatprep.subr.mxu1 %v620_v0  ;;  %470 = vmatprep.subr.mxu0 %v620_v0 }
  0x48   :  { %446 = vmatpush3.msra.mxu1 %v173_v15  ;;  %471 = vmatpush3.msra.mxu0 %v272_v26 }
  0x49   :  { %447 = vmatprep.subr.mxu1 %v620_v0  ;;  %472 = vmatprep.subr.mxu0 %v620_v0 }
  0x4a   :  { %448 = vmatpush3.msra.mxu1 %v172_v16  ;;  %473 = vmatpush3.msra.mxu0 %v271_v27 }
  0x4b   :  { %449 = vmatprep.subr.mxu1 %v620_v0  ;;  %474 = vmatprep.subr.mxu0 %v620_v0 }
  0x4c   :  { %450 = vmatpush3.msra.mxu1 %v171_v17  ;;  %475 = vmatpush3.msra.mxu0 %v270_v28 }
  0x4d   :  { %451 = vmatprep.subr.mxu1 %v620_v0  ;;  %476 = vmatprep.subr.mxu0 %v620_v0 }
  0x4e   :  { %452 = vmatpush3.msra.mxu1 %v170_v18  ;;  %477 = vmatpush3.msra.mxu0 %v269_v29 }
  0x4f   :  { %453 = vmatprep.subr.mxu1 %v620_v0  ;;  %478 = vmatprep.subr.mxu0 %v620_v0 }
  0x50   :  { %454 = vmatpush3.msra.mxu1 %v169_v19  ;;  %479 = vmatpush3.msra.mxu0 %v268_v30 }
  0x51   :  { %455 = vmatprep.subr.mxu1 %v620_v0  ;;  %480 = vmatprep.subr.mxu0 %v620_v0 }
  0x52   :  { %456 = vmatpush3.msra.mxu1 %v168_v20  ;;  %481 = vmatpush3.msra.mxu0 %v267_v31 }
  0x53   :  { %457 = vmatprep.subr.mxu1 %v620_v0  ;;  %482 = vmatprep.subr.mxu0 %v620_v0 }
  0x54   :  { %458 = vmatpush3.msra.mxu1 %v167_v21  ;;  %483 = vmatpush3.msra.mxu0 %v266_v32 }
  0x55   :  { %484 = vmatprep.subr.mxu0 %v620_v0 }
  0x56   :  { %485 = vmatpush3.msra.mxu0 %v265_v33 }
  0x57   :  { %486 = vmatprep.subr.mxu0 %v620_v0 }
  0x58   :  { %487 = vmatpush3.msra.mxu0 %v264_v34 }
  0x59   :  { %488 = vmatprep.subr.mxu0 %v620_v0 }
  0x5a   :  { %489 = vmatpush3.msra.mxu0 %v263_v40 }
  0x5b   :  { %490 = vmatprep.subr.mxu0 %v620_v0 }
  0x5c   :  { %491 = vmatpush3.msra.mxu0 %v262_v41 }
  0x5d   :  { %492 = vmatprep.subr.mxu0 %v620_v0 }
  0x5e   :  { %493 = vmatpush3.msra.mxu0 %v261_v42 }
  0xfd   :  { %v162_v36 = vpop.f32.mrf.mxu0 }
  0xfe   :  { %v163_v37 = vadd.f32 %v373_v35, %v162_v36 }
  0xff   :  { %v426_v38 = vpop.f32.mrf.mxu0 }
 0x100   :  { %v166_v39 = vmax.f32 %v163_v37, 0.0 }
 0x102   :  { %460 = vmatmul.mubr.f32.vlgmr.msra.gmra.mxu1 %v166_v39 }
 0x1c2   :  { %v256_v44 = vpop.f32.mrf.mxu1 }
 0x1c3   :  { %v257_v45 = vadd.f32 %v375_v43, %v256_v44 }
 0x1c4   :  { %v461_v46 = vpop.f32.mrf.mxu1 }
 0x1c5   :  { %v260_v47 = vmax.f32 %v257_v45, 0.0 }
 0x1c7   :  { %495 = vmatmul.mubr.f32.vlgmr.msra.gmra.mxu0 %v260_v47 }
 0x287   :  { %v350_v49 = vpop.f32.mrf.mxu0 }
 0x288   :  { %v351_v50 = vadd.f32 %v376_v48, %v350_v49 }
 0x289   :  { %v496_v51 = vpop.f32.mrf.mxu0 }
 0x28a   :  { %v354_v52 = vmax.f32 %v351_v50, 0.0 }
 0x28c   :  { %355 = vst [vmem:[#allocation10] sm:$0xff] %v354_v52 }
 0x28d   :  { %597 = shalt.err (!%p594_p10)
}
 0x28e   :  { %365 = dma.vmem_to_hbm [thread:$0]  %s363_s25, 128, %s745_s7, [#allocation4]  }
 0x28f   :  { %612 = dma.done.wait [#allocation4], 128  }
 0x290   :  { %613 = vsyncadd [#allocation4], 4294967168 }
 0x291   :  { %369 = vsyncpa [#allocation3], 1 }
 0x292   :  { %370 = vsyncpa [#allocation6], 1 }
 0x293   :  { %371 = vsyncpa [#allocation9], 1 }
 0x294   :  { %372 = vsyncpa [#allocation4], 1 }

// kernel: tpu_custom_call.1
= control target key start
LH: loop header
LB: loop body
LE: loop exit
PB: predicated region body
PF: predicated region fallthrough
CT: control target
= control target key end

     0   :  { %12 = vsyncpa [#allocation3], 0  ;;  %s738_s0 = inlined_call_operand.hbm [shape: f32[8,32], index: 0, kind: input, shape index: {}]   ;;  %s739_s1 = inlined_call_operand.hbm [shape: f32[32,128], index: 1, kind: input, shape index: {}]   ;;  %s740_s2 = inlined_call_operand.vmem [shape: f32[1,128], index: 2, kind: input, shape index: {}]   ;;  %s741_s3 = inlined_call_operand.hbm [shape: f32[128,128], index: 3, kind: input, shape index: {}]   ;;  %s742_s4 = inlined_call_operand.vmem [shape: f32[1,128], index: 4, kind: input, shape index: {}]   ;;  %s743_s5 = inlined_call_operand.hbm [shape: f32[128,128], index: 5, kind: input, shape index: {}]   ;;  %s744_s6 = inlined_call_operand.vmem [shape: f32[1,128], index: 6, kind: input, shape index: {}]   ;;  %s745_s7 = inlined_call_operand.hbm [shape: f32[8,128], index: 7, kind: output, shape index: {}]  }
   0x1   :  { %13 = vsyncpa [#allocation6], 0 }
   0x2   :  { %14 = vsyncpa [#allocation9], 0 }
   0x3   :  { %15 = vsyncpa [#allocation4], 0  ;;  %s614_s24 = smov [#allocation5]  }
   0x4   :  { %s31_s25 = sshll.u32 %s614_s24, 4  ;;  %s32_s25 = int_to_ptr.vmem [resolvable:$true] %s31_s25 }
   0x5   :  { %s514_s26 = scalar_lea.vmem %s32_s25, 512  ;;  %p519_p1 = scmp.lt.s32.totalorder %s32_s25, %s32_s25 }
   0x6   :  { %p515_p0 = scmp.ne.s32.totalorder %s32_s25, %s514_s26  ;;  %p520_p2 = scmp.lt.s32.totalorder %s514_s26, %s514_s26 }
   0x8   :  { %p521_p3 = por %p520_p2, %p519_p1 }
   0xa   :  { %p522_p4 = pnand %p521_p3, %p515_p0 }
   0xc   :  { %525 = shalt.err (!%p522_p4)
}
   0xd   :  { %s615_s27 = smov 128   ;;  %s616_s28 = smov 8  }
   0xe   :  { %37 = dma.hbm_to_vmem [thread:$0]  %s739_s1, 512, %s32_s25, [#allocation6], %s615_s27, %s615_s27, %s616_s28  }
   0xf   :  { %s617_s8 = smov [#allocation2]   ;;  %s618_s10 = smov [#allocation7]  }
  0x10   :  { %s22_s9 = sshll.u32 %s617_s8, 4  ;;  %s45_s11 = sshll.u32 %s618_s10, 4  ;;  %s23_s9 = int_to_ptr.vmem [resolvable:$true] %s22_s9  ;;  %s46_s11 = int_to_ptr.vmem [resolvable:$true] %s45_s11 }
  0x11   :  { %s534_s12 = scalar_lea.vmem %s23_s9, 128  ;;  %p539_p6 = scmp.lt.s32.totalorder %s23_s9, %s23_s9 }
  0x12   :  { %p535_p5 = scmp.ne.s32.totalorder %s23_s9, %s534_s12  ;;  %p540_p7 = scmp.lt.s32.totalorder %s534_s12, %s534_s12 }
  0x14   :  { %p541_p8 = por %p540_p7, %p539_p6 }
  0x16   :  { %p542_p9 = pnand %p541_p8, %p535_p5 }
  0x18   :  { %545 = shalt.err (!%p542_p9)
}
  0x19   :  { %25 = dma.hbm_to_vmem [thread:$0]  %s738_s0, 128, %s23_s9, [#allocation3]  }
  0x1a   :  { %s554_s15 = scalar_lea.vmem %s46_s11, 2048  ;;  %p559_p11 = scmp.lt.s32.totalorder %s46_s11, %s46_s11 }
  0x1b   :  { %p555_p10 = scmp.ne.s32.totalorder %s46_s11, %s554_s15  ;;  %p560_p12 = scmp.lt.s32.totalorder %s554_s15, %s554_s15 }
  0x1d   :  { %p561_p13 = por %p560_p12, %p559_p11 }
  0x1f   :  { %p562_p0 = pnand %p561_p13, %p555_p10 }
  0x21   :  { %565 = shalt.err (!%p562_p0)
}
  0x22   :  { %51 = dma.hbm_to_vmem [thread:$0]  %s741_s3, 2048, %s46_s11, [#allocation6], %s615_s27, %s615_s27, %s616_s28  }
  0x23   :  { %s619_s17 = smov [#allocation8]  }
  0x24   :  { %s59_s18 = sshll.u32 %s619_s17, 4  ;;  %s60_s18 = int_to_ptr.vmem [resolvable:$true] %s59_s18 }
  0x25   :  { %s574_s19 = scalar_lea.vmem %s60_s18, 2048  ;;  %p579_p2 = scmp.lt.s32.totalorder %s60_s18, %s60_s18 }
  0x26   :  { %p575_p1 = scmp.ne.s32.totalorder %s60_s18, %s574_s19  ;;  %p580_p3 = scmp.lt.s32.totalorder %s574_s19, %s574_s19 }
  0x28   :  { %p581_p4 = por %p580_p3, %p579_p2 }
  0x2a   :  { %p582_p5 = pnand %p581_p4, %p575_p1 }
  0x2c   :  { %585 = shalt.err (!%p582_p5)
}
  0x2d   :  { %65 = dma.hbm_to_vmem [thread:$0]  %s743_s5, 2048, %s60_s18, [#allocation9], %s615_s27, %s615_s27, %s616_s28  }
  0x2e   :  { %606 = dma.done.wait [#allocation3], 128  }
  0x2f   :  { %607 = vsyncadd [#allocation3], 4294967168 }
  0x30   :  { %608 = dma.done.wait [#allocation6], 2560  }
  0x31   :  { %609 = vsyncadd [#allocation6], 4294964736 }
  0x32   :  { %610 = dma.done.wait [#allocation9], 2048  }
  0x33   :  { %611 = vsyncadd [#allocation9], 4294965248  ;;  %v620_v0 = vmov 0.0   ;;  %vm621_vm0 = vmmov 0   ;;  %v84_v1 = vld [vmem:[#allocation5 + $0x18] sm:$0xff]  ;;  %v83_v2 = vld [vmem:[#allocation5 + $0x10] sm:$0xff] }
  0x34   :  { %416 = vmatprep.subr.mxu0 %v620_v0  ;;  %424 = vmatprep.mubr.msk.f32.mxu0 %vm621_vm0, %v620_v0  ;;  %v182_v3 = vld [vmem:[#allocation7 + $0x78] sm:$0xff]  ;;  %v82_v4 = vld [vmem:[#allocation5 + $0x8] sm:$0xff]  ;;  %v181_v5 = vld [vmem:[#allocation7 + $0x70] sm:$0xff]  ;;  %vm92_vm1 = vcmask 261120   ;;  %s622_s24 = smov [#allocation10]  }
  0x35   :  { %427 = vmatprep.subr.mxu1 %v620_v0  ;;  %459 = vmatprep.mubr.msk.f32.mxu1 %vm621_vm0, %v620_v0  ;;  %v180_v6 = vld [vmem:[#allocation7 + $0x68] sm:$0xff]  ;;  %v81_v7 = vld [vmem:[#allocation5] sm:$0xff]  ;;  %v80_v8 = vld [vmem:[#allocation2] sm:$0xff]  ;;  %s362_s25 = sshll.u32 %s622_s24, 4  ;;  %s363_s25 = int_to_ptr.vmem [resolvable:$true] %s362_s25 }
  0x36   :  { %417 = vmatpush3.msra.mxu0 %v84_v1  ;;  %428 = vmatpush3.msra.mxu1 %v182_v3  ;;  %v179_v9 = vld [vmem:[#allocation7 + $0x60] sm:$0xff]  ;;  %v178_v10 = vld [vmem:[#allocation7 + $0x58] sm:$0xff]  ;;  %v177_v11 = vld [vmem:[#allocation7 + $0x50] sm:$0xff]  ;;  %s586_s26 = scalar_lea.vmem %s363_s25, 128  ;;  %p591_p7 = scmp.lt.s32.totalorder %s363_s25, %s363_s25 }
  0x37   :  { %418 = vmatprep.subr.mxu0 %v620_v0  ;;  %429 = vmatprep.subr.mxu1 %v620_v0  ;;  %v176_v12 = vld [vmem:[#allocation7 + $0x48] sm:$0xff]  ;;  %v175_v13 = vld [vmem:[#allocation7 + $0x40] sm:$0xff]  ;;  %v174_v14 = vld [vmem:[#allocation7 + $0x38] sm:$0xff]  ;;  %p587_p6 = scmp.ne.s32.totalorder %s363_s25, %s586_s26  ;;  %p592_p8 = scmp.lt.s32.totalorder %s586_s26, %s586_s26 }
  0x38   :  { %419 = vmatpush3.msra.mxu0 %v83_v2  ;;  %430 = vmatpush3.msra.mxu1 %v181_v5  ;;  %v173_v15 = vld [vmem:[#allocation7 + $0x30] sm:$0xff]  ;;  %v172_v16 = vld [vmem:[#allocation7 + $0x28] sm:$0xff]  ;;  %v171_v17 = vld [vmem:[#allocation7 + $0x20] sm:$0xff] }
  0x39   :  { %420 = vmatprep.subr.mxu0 %v620_v0  ;;  %431 = vmatprep.subr.mxu1 %v620_v0  ;;  %v170_v18 = vld [vmem:[#allocation7 + $0x18] sm:$0xff]  ;;  %v169_v19 = vld [vmem:[#allocation7 + $0x10] sm:$0xff]  ;;  %v168_v20 = vld [vmem:[#allocation7 + $0x8] sm:$0xff]  ;;  %p593_p9 = por %p592_p8, %p591_p7 }
  0x3a   :  { %421 = vmatpush3.msra.mxu0 %v82_v4  ;;  %432 = vmatpush3.msra.mxu1 %v180_v6  ;;  %v167_v21 = vld [vmem:[#allocation7] sm:$0xff]  ;;  %v276_v22 = vld [vmem:[#allocation8 + $0x78] sm:$0xff]  ;;  %v275_v23 = vld [vmem:[#allocation8 + $0x70] sm:$0xff] }
  0x3b   :  { %422 = vmatprep.subr.mxu0 %v620_v0  ;;  %433 = vmatprep.subr.mxu1 %v620_v0  ;;  %v274_v24 = vld [vmem:[#allocation8 + $0x68] sm:$0xff]  ;;  %v273_v25 = vld [vmem:[#allocation8 + $0x60] sm:$0xff]  ;;  %v272_v26 = vld [vmem:[#allocation8 + $0x58] sm:$0xff]  ;;  %p594_p10 = pnand %p593_p9, %p587_p6 }
  0x3c   :  { %423 = vmatpush3.msra.mxu0 %v81_v7  ;;  %434 = vmatpush3.msra.mxu1 %v179_v9  ;;  %v271_v27 = vld [vmem:[#allocation8 + $0x50] sm:$0xff]  ;;  %v270_v28 = vld [vmem:[#allocation8 + $0x48] sm:$0xff]  ;;  %v269_v29 = vld [vmem:[#allocation8 + $0x40] sm:$0xff] }
  0x3d   :  { %425 = vmatmul.mubr.msk.f32.vlgmr.msra.gmra.mxu0 %vm92_vm1, %v80_v8  ;;  %435 = vmatprep.subr.mxu1 %v620_v0  ;;  %v268_v30 = vld [vmem:[#allocation8 + $0x38] sm:$0xff]  ;;  %v267_v31 = vld [vmem:[#allocation8 + $0x30] sm:$0xff]  ;;  %v266_v32 = vld [vmem:[#allocation8 + $0x28] sm:$0xff] }
  0x3e   :  { %462 = vmatprep.subr.mxu0 %v620_v0  ;;  %436 = vmatpush3.msra.mxu1 %v178_v10  ;;  %v265_v33 = vld [vmem:[#allocation8 + $0x20] sm:$0xff]  ;;  %v264_v34 = vld [vmem:[#allocation8 + $0x18] sm:$0xff]  ;;  %v263_v40 = vld [vmem:[#allocation8 + $0x10] sm:$0xff] }
  0x3f   :  { %494 = vmatprep.mubr.msk.f32.mxu0 %vm621_vm0, %v620_v0  ;;  %437 = vmatprep.subr.mxu1 %v620_v0  ;;  %v373_v35 = vld [vmem:[%s740_s2] ss:$0 sm:$0xff]  ;;  %v262_v41 = vld [vmem:[#allocation8 + $0x8] sm:$0xff]  ;;  %v261_v42 = vld [vmem:[#allocation8] sm:$0xff] }
  0x40   :  { %438 = vmatpush3.msra.mxu1 %v177_v11  ;;  %463 = vmatpush3.msra.mxu0 %v276_v22  ;;  %v375_v43 = vld [vmem:[%s742_s4] ss:$0 sm:$0xff] }
  0x41   :  { %439 = vmatprep.subr.mxu1 %v620_v0  ;;  %464 = vmatprep.subr.mxu0 %v620_v0  ;;  %v376_v48 = vld [vmem:[%s744_s6] ss:$0 sm:$0xff] }
  0x42   :  { %440 = vmatpush3.msra.mxu1 %v176_v12  ;;  %465 = vmatpush3.msra.mxu0 %v275_v23 }
  0x43   :  { %441 = vmatprep.subr.mxu1 %v620_v0  ;;  %466 = vmatprep.subr.mxu0 %v620_v0 }
  0x44   :  { %442 = vmatpush3.msra.mxu1 %v175_v13  ;;  %467 = vmatpush3.msra.mxu0 %v274_v24 }
  0x45   :  { %443 = vmatprep.subr.mxu1 %v620_v0  ;;  %468 = vmatprep.subr.mxu0 %v620_v0 }
  0x46   :  { %444 = vmatpush3.msra.mxu1 %v174_v14  ;;  %469 = vmatpush3.msra.mxu0 %v273_v25 }
  0x47   :  { %445 = vmatprep.subr.mxu1 %v620_v0  ;;  %470 = vmatprep.subr.mxu0 %v620_v0 }
  0x48   :  { %446 = vmatpush3.msra.mxu1 %v173_v15  ;;  %471 = vmatpush3.msra.mxu0 %v272_v26 }
  0x49   :  { %447 = vmatprep.subr.mxu1 %v620_v0  ;;  %472 = vmatprep.subr.mxu0 %v620_v0 }
  0x4a   :  { %448 = vmatpush3.msra.mxu1 %v172_v16  ;;  %473 = vmatpush3.msra.mxu0 %v271_v27 }
  0x4b   :  { %449 = vmatprep.subr.mxu1 %v620_v0  ;;  %474 = vmatprep.subr.mxu0 %v620_v0 }
  0x4c   :  { %450 = vmatpush3.msra.mxu1 %v171_v17  ;;  %475 = vmatpush3.msra.mxu0 %v270_v28 }
  0x4d   :  { %451 = vmatprep.subr.mxu1 %v620_v0  ;;  %476 = vmatprep.subr.mxu0 %v620_v0 }
  0x4e   :  { %452 = vmatpush3.msra.mxu1 %v170_v18  ;;  %477 = vmatpush3.msra.mxu0 %v269_v29 }
  0x4f   :  { %453 = vmatprep.subr.mxu1 %v620_v0  ;;  %478 = vmatprep.subr.mxu0 %v620_v0 }
  0x50   :  { %454 = vmatpush3.msra.mxu1 %v169_v19  ;;  %479 = vmatpush3.msra.mxu0 %v268_v30 }
  0x51   :  { %455 = vmatprep.subr.mxu1 %v620_v0  ;;  %480 = vmatprep.subr.mxu0 %v620_v0 }
  0x52   :  { %456 = vmatpush3.msra.mxu1 %v168_v20  ;;  %481 = vmatpush3.msra.mxu0 %v267_v31 }
  0x53   :  { %457 = vmatprep.subr.mxu1 %v620_v0  ;;  %482 = vmatprep.subr.mxu0 %v620_v0 }
  0x54   :  { %458 = vmatpush3.msra.mxu1 %v167_v21  ;;  %483 = vmatpush3.msra.mxu0 %v266_v32 }
  0x55   :  { %484 = vmatprep.subr.mxu0 %v620_v0 }
  0x56   :  { %485 = vmatpush3.msra.mxu0 %v265_v33 }
  0x57   :  { %486 = vmatprep.subr.mxu0 %v620_v0 }
  0x58   :  { %487 = vmatpush3.msra.mxu0 %v264_v34 }
  0x59   :  { %488 = vmatprep.subr.mxu0 %v620_v0 }
  0x5a   :  { %489 = vmatpush3.msra.mxu0 %v263_v40 }
  0x5b   :  { %490 = vmatprep.subr.mxu0 %v620_v0 }
  0x5c   :  { %491 = vmatpush3.msra.mxu0 %v262_v41 }
  0x5d   :  { %492 = vmatprep.subr.mxu0 %v620_v0 }
  0x5e   :  { %493 = vmatpush3.msra.mxu0 %v261_v42 }
  0xfd   :  { %v162_v36 = vpop.f32.mrf.mxu0 }
  0xfe   :  { %v163_v37 = vadd.f32 %v373_v35, %v162_v36 }
  0xff   :  { %v426_v38 = vpop.f32.mrf.mxu0 }
 0x100   :  { %v166_v39 = vmax.f32 %v163_v37, 0.0 }
 0x102   :  { %460 = vmatmul.mubr.f32.vlgmr.msra.gmra.mxu1 %v166_v39 }
 0x1c2   :  { %v256_v44 = vpop.f32.mrf.mxu1 }
 0x1c3   :  { %v257_v45 = vadd.f32 %v375_v43, %v256_v44 }
 0x1c4   :  { %v461_v46 = vpop.f32.mrf.mxu1 }
 0x1c5   :  { %v260_v47 = vmax.f32 %v257_v45, 0.0 }
 0x1c7   :  { %495 = vmatmul.mubr.f32.vlgmr.msra.gmra.mxu0 %v260_v47 }
 0x287   :  { %v350_v49 = vpop.f32.mrf.mxu0 }
 0x288   :  { %v351_v50 = vadd.f32 %v376_v48, %v350_v49 }
 0x289   :  { %v496_v51 = vpop.f32.mrf.mxu0 }
 0x28a   :  { %v354_v52 = vmax.f32 %v351_v50, 0.0 }
 0x28c   :  { %355 = vst [vmem:[#allocation10] sm:$0xff] %v354_v52 }
 0x28d   :  { %597 = shalt.err (!%p594_p10)
}
 0x28e   :  { %365 = dma.vmem_to_hbm [thread:$0]  %s363_s25, 128, %s745_s7, [#allocation4]  }
 0x28f   :  { %612 = dma.done.wait [#allocation4], 128  }
 0x290   :  { %613 = vsyncadd [#allocation4], 4294967168 }
 0x291   :  { %369 = vsyncpa [#allocation3], 1 }
 0x292   :  { %370 = vsyncpa [#allocation6], 1 }
 0x293   :  { %371 = vsyncpa [#allocation9], 1 }
 0x294   :  { %372 = vsyncpa [#allocation4], 1 }

</bundles_post_ra>
